<compile_context>
chip_gen: v5e
topology: v5e:2x2
jax: 0.10.0
libtpu: 0.0.40
codegen_flags: <defaults>
</compile_context>

<pallas_src>
import functools

import jax
import jax.numpy as jnp
from jax.experimental import pallas as pl
from jax.experimental.pallas import tpu as pltpu

NB_FEATURES = 27
HIDDEN = 200
OUT = 7

F_PAD = 32    # 27 -> 32  : aligned K for the first matmul
H_PAD = 256   # 200 -> 256: lane-dense hidden activations, clean MXU tiles
O_PAD = 128   # 7 -> 128  : lane-dense output stores (no masked partial stores)


def _round_up(n, m):
    return (n + m - 1) // m * m


def _num_tensorcores():
    """Best-effort TensorCore count (v7x: 2, v5e/v6e: 1). Defaults to 1."""
    try:
        info = pltpu.get_tpu_info()
    except Exception:
        return 1
    for attr in ("num_cores", "num_tensorcores", "tensor_cores",
                 "cores_per_chip", "num_cores_per_chip"):
        v = getattr(info, attr, None)
        if isinstance(v, int) and v > 0:
            return v
    return 1


def mlp_kernel(x_ref, w1_ref, b1_ref, w2_ref, b2_ref, w3_ref, b3_ref,
               w4_ref, b4_ref, o_ref):
    # x / weights arrive in bf16 -> bf16 MXU passes with f32 accumulation.
    # Bias-add and ReLU stay in f32.
    h = jnp.dot(x_ref[...], w1_ref[...],
                preferred_element_type=jnp.float32) + b1_ref[...]
    h = jnp.maximum(h, 0.0)

    h = jnp.dot(h.astype(jnp.bfloat16), w2_ref[...],
                preferred_element_type=jnp.float32) + b2_ref[...]
    h = jnp.maximum(h, 0.0)

    h = jnp.dot(h.astype(jnp.bfloat16), w3_ref[...],
                preferred_element_type=jnp.float32) + b3_ref[...]
    h = jnp.maximum(h, 0.0)

    o_ref[...] = (jnp.dot(h.astype(jnp.bfloat16), w4_ref[...],
                          preferred_element_type=jnp.float32)
                  + b4_ref[...]).astype(o_ref.dtype)


def _pad2(a, rows, cols, dtype):
    a = jnp.asarray(a, jnp.float32)
    r, c = a.shape
    return jnp.pad(a, ((0, rows - r), (0, cols - c))).astype(dtype)


def prepare_params(params):
    """One-time conversion: pad to MXU-friendly shapes, cast weights to bf16."""
    w1, b1, w2, b2, w3, b3, w4, b4 = params
    return (
        _pad2(w1, F_PAD, H_PAD, jnp.bfloat16), _pad2(b1, 1, H_PAD, jnp.float32),
        _pad2(w2, H_PAD, H_PAD, jnp.bfloat16), _pad2(b2, 1, H_PAD, jnp.float32),
        _pad2(w3, H_PAD, H_PAD, jnp.bfloat16), _pad2(b3, 1, H_PAD, jnp.float32),
        _pad2(w4, H_PAD, O_PAD, jnp.bfloat16), _pad2(b4, 1, O_PAD, jnp.float32),
    )


@functools.partial(jax.jit, static_argnames=("batch_tile",))
def net_forward(x, padded_params, *, batch_tile=512):
    """Forward pass. `padded_params` must come from prepare_params()."""
    w1p, b1p, w2p, b2p, w3p, b3p, w4p, b4p = padded_params
    B, F = x.shape
    assert F == NB_FEATURES

    # Batch tile: as large as the batch allows (fewer grid steps, taller MXU M).
    tile = min(batch_tile, _round_up(B, 16))
    # Megacore split: only on multi-TC chips (v7x) and only when each core
    # still gets >= 128 rows; on v5e/v6e (1 TC) a split is pure overhead.
    if (_num_tensorcores() >= 2 and tile >= 256
            and _round_up(B, tile) // tile < 2):
        tile = _round_up(tile // 2, 16)
    B_pad = _round_up(B, tile)

    # Only x is padded/cast per call (single fused op); weights were prepared once.
    x_p = jnp.pad(x.astype(jnp.float32),
                  ((0, B_pad - B), (0, F_PAD - F))).astype(jnp.bfloat16)

    def full_spec(shape):
        # Whole-array block, constant index -> stays resident in VMEM across
        # the batch grid.  (pipeline_mode=pl.Buffered(1) would drop the unused
        # second buffer; skipped since the ~0.35 MiB saving is negligible.)
        return pl.BlockSpec(shape, lambda i: (0, 0))

    grid = (B_pad // tile,)

    out = pl.pallas_call(
        mlp_kernel,
        out_shape=jax.ShapeDtypeStruct((B_pad, O_PAD), jnp.float32),
        grid_spec=pltpu.PrefetchScalarGridSpec(
            num_scalar_prefetch=0,
            grid=grid,
            in_specs=[
                pl.BlockSpec((tile, F_PAD), lambda i: (i, 0)),     # x tile
                full_spec((F_PAD, H_PAD)), full_spec((1, H_PAD)),  # fc1
                full_spec((H_PAD, H_PAD)), full_spec((1, H_PAD)),  # fc2
                full_spec((H_PAD, H_PAD)), full_spec((1, H_PAD)),  # fc3
                full_spec((H_PAD, O_PAD)), full_spec((1, O_PAD)),  # fc4
            ],
            out_specs=pl.BlockSpec((tile, O_PAD), lambda i: (i, 0)),
        ),
        compiler_params=pltpu.CompilerParams(
            dimension_semantics=("parallel",),
            vmem_limit_bytes=16 * 1024 * 1024,
        ),
    )(x_p, w1p, b1p, w2p, b2p, w3p, b3p, w4p, b4p)

    # Strip batch padding and the lane padding of the 7-wide output.
    return out[:B, :OUT]


def init_params(key):
    """Deterministic init mimicking nn.Linear's U(-1/sqrt(fan_in), 1/sqrt(fan_in))."""
    dims = [(NB_FEATURES, HIDDEN), (HIDDEN, HIDDEN), (HIDDEN, HIDDEN), (HIDDEN, OUT)]
    params = []
    for (fan_in, fan_out) in dims:
        key, kw, kb = jax.random.split(key, 3)
        bound = 1.0 / jnp.sqrt(fan_in)
        w = jax.random.uniform(kw, (fan_in, fan_out), jnp.float32, -bound, bound)
        b = jax.random.uniform(kb, (1, fan_out), jnp.float32, -bound, bound)
        params += [w, b]
    return tuple(params)


def net_forward_ref(x, params, matmul_dtype=jnp.float32):
    """Pure-JAX reference. matmul_dtype=bfloat16 mirrors the kernel's MXU path."""
    w1, b1, w2, b2, w3, b3, w4, b4 = params

    def dot(a, w):
        return jnp.dot(a.astype(matmul_dtype), w.astype(matmul_dtype),
                       preferred_element_type=jnp.float32)

    h = jnp.maximum(dot(x, w1) + b1, 0.0)
    h = jnp.maximum(dot(h, w2) + b2, 0.0)
    h = jnp.maximum(dot(h, w3) + b3, 0.0)
    return dot(h, w4) + b4


if __name__ == "__main__":
    key = jax.random.PRNGKey(0)
    key, kx = jax.random.split(key)

    # small, deliberately non-multiple-of-8 batch to exercise the padding path
    batch = 19
    x = jax.random.normal(kx, (batch, NB_FEATURES), jnp.float32)
    params = init_params(key)
    padded_params = prepare_params(params)   # one-time, outside the hot path

    out = net_forward(x, padded_params)
    out = jax.block_until_ready(out)
    assert out.shape == (batch, OUT)

    # Tight check against a bf16-matmul reference (same numerics as the kernel),
    # loose check against the full-f32 reference (bf16 MXU => ~1e-2 rel error).
    ref_bf16 = net_forward_ref(x, params, matmul_dtype=jnp.bfloat16)
    ref_f32 = net_forward_ref(x, params, matmul_dtype=jnp.float32)
    assert jnp.allclose(out, ref_bf16, atol=1e-2, rtol=1e-2)
    assert jnp.allclose(out, ref_f32, atol=5e-2, rtol=5e-2)

    print("KERNEL_OK")
</pallas_src>

<mosaic_0001>
module attributes {stable_mosaic.version = 11 : i64} {
  func.func @mlp_kernel(%arg0: i32, %arg1: memref<32x32xbf16, #tpu.memory_space<vmem>>, %arg2: memref<32x256xbf16, #tpu.memory_space<vmem>>, %arg3: memref<1x256xf32, #tpu.memory_space<vmem>>, %arg4: memref<256x256xbf16, #tpu.memory_space<vmem>>, %arg5: memref<1x256xf32, #tpu.memory_space<vmem>>, %arg6: memref<256x256xbf16, #tpu.memory_space<vmem>>, %arg7: memref<1x256xf32, #tpu.memory_space<vmem>>, %arg8: memref<256x128xbf16, #tpu.memory_space<vmem>>, %arg9: memref<1x128xf32, #tpu.memory_space<vmem>>, %arg10: memref<32x128xf32, #tpu.memory_space<vmem>>) attributes {dimension_semantics = [#tpu.dimension_semantics<parallel>], iteration_bounds = array<i64: 1>, scalar_prefetch = 0 : i64, scratch_operands = 0 : i64, tpu.core_type = #tpu.core_type<tc>, window_params = [{transform_indices = @transform_0, window_bounds = array<i64: 32, 32>}, {pipeline_mode = #tpu.pipeline_mode<synchronous>, transform_indices = @transform_1, window_bounds = array<i64: 32, 256>}, {pipeline_mode = #tpu.pipeline_mode<synchronous>, transform_indices = @transform_2, window_bounds = array<i64: 1, 256>}, {pipeline_mode = #tpu.pipeline_mode<synchronous>, transform_indices = @transform_3, window_bounds = array<i64: 256, 256>}, {pipeline_mode = #tpu.pipeline_mode<synchronous>, transform_indices = @transform_4, window_bounds = array<i64: 1, 256>}, {pipeline_mode = #tpu.pipeline_mode<synchronous>, transform_indices = @transform_5, window_bounds = array<i64: 256, 256>}, {pipeline_mode = #tpu.pipeline_mode<synchronous>, transform_indices = @transform_6, window_bounds = array<i64: 1, 256>}, {pipeline_mode = #tpu.pipeline_mode<synchronous>, transform_indices = @transform_7, window_bounds = array<i64: 256, 128>}, {pipeline_mode = #tpu.pipeline_mode<synchronous>, transform_indices = @transform_8, window_bounds = array<i64: 1, 128>}, {transform_indices = @transform_9, window_bounds = array<i64: 32, 128>}]} {
    %c0 = arith.constant 0 : index
    %c0_0 = arith.constant 0 : index
    %0 = vector.load %arg1[%c0, %c0_0] : memref<32x32xbf16, #tpu.memory_space<vmem>>, vector<32x32xbf16>
    %c0_1 = arith.constant 0 : index
    %c0_2 = arith.constant 0 : index
    %1 = vector.load %arg2[%c0_1, %c0_2] : memref<32x256xbf16, #tpu.memory_space<vmem>>, vector<32x256xbf16>
    %cst = arith.constant dense<0.000000e+00> : vector<32x256xf32>
    %2 = tpu.matmul %0, %1, %cst {dimension_numbers = #tpu.dot_dimension_numbers<[1], [0], [0], [1], [0, 0, 1, 1], [], []>} : vector<32x32xbf16>, vector<32x256xbf16>, vector<32x256xf32> -> vector<32x256xf32>
    %c0_3 = arith.constant 0 : index
    %c0_4 = arith.constant 0 : index
    %3 = vector.load %arg3[%c0_3, %c0_4] : memref<1x256xf32, #tpu.memory_space<vmem>>, vector<1x256xf32>
    %4 = vector.broadcast %3 : vector<1x256xf32> to vector<32x256xf32>
    %5 = arith.addf %2, %4 : vector<32x256xf32>
    %cst_5 = arith.constant 0.000000e+00 : f32
    %6 = vector.broadcast %cst_5 : f32 to vector<32x256xf32>
    %7 = arith.maximumf %5, %6 : vector<32x256xf32>
    %8 = arith.truncf %7 : vector<32x256xf32> to vector<32x256xbf16>
    %c0_6 = arith.constant 0 : index
    %c0_7 = arith.constant 0 : index
    %9 = vector.load %arg4[%c0_6, %c0_7] : memref<256x256xbf16, #tpu.memory_space<vmem>>, vector<256x256xbf16>
    %cst_8 = arith.constant dense<0.000000e+00> : vector<32x256xf32>
    %10 = tpu.matmul %8, %9, %cst_8 {dimension_numbers = #tpu.dot_dimension_numbers<[1], [0], [0], [1], [0, 0, 1, 1], [], []>} : vector<32x256xbf16>, vector<256x256xbf16>, vector<32x256xf32> -> vector<32x256xf32>
    %c0_9 = arith.constant 0 : index
    %c0_10 = arith.constant 0 : index
    %11 = vector.load %arg5[%c0_9, %c0_10] : memref<1x256xf32, #tpu.memory_space<vmem>>, vector<1x256xf32>
    %12 = vector.broadcast %11 : vector<1x256xf32> to vector<32x256xf32>
    %13 = arith.addf %10, %12 : vector<32x256xf32>
    %cst_11 = arith.constant 0.000000e+00 : f32
    %14 = vector.broadcast %cst_11 : f32 to vector<32x256xf32>
    %15 = arith.maximumf %13, %14 : vector<32x256xf32>
    %16 = arith.truncf %15 : vector<32x256xf32> to vector<32x256xbf16>
    %c0_12 = arith.constant 0 : index
    %c0_13 = arith.constant 0 : index
    %17 = vector.load %arg6[%c0_12, %c0_13] : memref<256x256xbf16, #tpu.memory_space<vmem>>, vector<256x256xbf16>
    %cst_14 = arith.constant dense<0.000000e+00> : vector<32x256xf32>
    %18 = tpu.matmul %16, %17, %cst_14 {dimension_numbers = #tpu.dot_dimension_numbers<[1], [0], [0], [1], [0, 0, 1, 1], [], []>} : vector<32x256xbf16>, vector<256x256xbf16>, vector<32x256xf32> -> vector<32x256xf32>
    %c0_15 = arith.constant 0 : index
    %c0_16 = arith.constant 0 : index
    %19 = vector.load %arg7[%c0_15, %c0_16] : memref<1x256xf32, #tpu.memory_space<vmem>>, vector<1x256xf32>
    %20 = vector.broadcast %19 : vector<1x256xf32> to vector<32x256xf32>
    %21 = arith.addf %18, %20 : vector<32x256xf32>
    %cst_17 = arith.constant 0.000000e+00 : f32
    %22 = vector.broadcast %cst_17 : f32 to vector<32x256xf32>
    %23 = arith.maximumf %21, %22 : vector<32x256xf32>
    %24 = arith.truncf %23 : vector<32x256xf32> to vector<32x256xbf16>
    %c0_18 = arith.constant 0 : index
    %c0_19 = arith.constant 0 : index
    %25 = vector.load %arg8[%c0_18, %c0_19] : memref<256x128xbf16, #tpu.memory_space<vmem>>, vector<256x128xbf16>
    %cst_20 = arith.constant dense<0.000000e+00> : vector<32x128xf32>
    %26 = tpu.matmul %24, %25, %cst_20 {dimension_numbers = #tpu.dot_dimension_numbers<[1], [0], [0], [1], [0, 0, 1, 1], [], []>} : vector<32x256xbf16>, vector<256x128xbf16>, vector<32x128xf32> -> vector<32x128xf32>
    %c0_21 = arith.constant 0 : index
    %c0_22 = arith.constant 0 : index
    %27 = vector.load %arg9[%c0_21, %c0_22] : memref<1x128xf32, #tpu.memory_space<vmem>>, vector<1x128xf32>
    %28 = vector.broadcast %27 : vector<1x128xf32> to vector<32x128xf32>
    %29 = arith.addf %26, %28 : vector<32x128xf32>
    %c0_23 = arith.constant 0 : index
    %c0_24 = arith.constant 0 : index
    %30 = vector.load %arg10[%c0_23, %c0_24] : memref<32x128xf32, #tpu.memory_space<vmem>>, vector<32x128xf32>
    tpu.vector_store %arg10[%c0_23, %c0_24], %29 {strides = array<i32>} : memref<32x128xf32, #tpu.memory_space<vmem>>, vector<32x128xf32>,
    return
  }
  func.func @transform_0(%arg0: i32) -> (i32, i32) {
    %c0_i32 = arith.constant 0 : i32
    %c0_i32_0 = arith.constant 0 : i32
    return %arg0, %c0_i32 : i32, i32
  }
  func.func @transform_1(%arg0: i32) -> (i32, i32) {
    %c0_i32 = arith.constant 0 : i32
    %c0_i32_0 = arith.constant 0 : i32
    %c0_i32_1 = arith.constant 0 : i32
    return %c0_i32, %c0_i32_0 : i32, i32
  }
  func.func @transform_2(%arg0: i32) -> (i32, i32) {
    %c0_i32 = arith.constant 0 : i32
    %c0_i32_0 = arith.constant 0 : i32
    %c0_i32_1 = arith.constant 0 : i32
    return %c0_i32, %c0_i32_0 : i32, i32
  }
  func.func @transform_3(%arg0: i32) -> (i32, i32) {
    %c0_i32 = arith.constant 0 : i32
    %c0_i32_0 = arith.constant 0 : i32
    %c0_i32_1 = arith.constant 0 : i32
    return %c0_i32, %c0_i32_0 : i32, i32
  }
  func.func @transform_4(%arg0: i32) -> (i32, i32) {
    %c0_i32 = arith.constant 0 : i32
    %c0_i32_0 = arith.constant 0 : i32
    %c0_i32_1 = arith.constant 0 : i32
    return %c0_i32, %c0_i32_0 : i32, i32
  }
  func.func @transform_5(%arg0: i32) -> (i32, i32) {
    %c0_i32 = arith.constant 0 : i32
    %c0_i32_0 = arith.constant 0 : i32
    %c0_i32_1 = arith.constant 0 : i32
    return %c0_i32, %c0_i32_0 : i32, i32
  }
  func.func @transform_6(%arg0: i32) -> (i32, i32) {
    %c0_i32 = arith.constant 0 : i32
    %c0_i32_0 = arith.constant 0 : i32
    %c0_i32_1 = arith.constant 0 : i32
    return %c0_i32, %c0_i32_0 : i32, i32
  }
  func.func @transform_7(%arg0: i32) -> (i32, i32) {
    %c0_i32 = arith.constant 0 : i32
    %c0_i32_0 = arith.constant 0 : i32
    %c0_i32_1 = arith.constant 0 : i32
    return %c0_i32, %c0_i32_0 : i32, i32
  }
  func.func @transform_8(%arg0: i32) -> (i32, i32) {
    %c0_i32 = arith.constant 0 : i32
    %c0_i32_0 = arith.constant 0 : i32
    %c0_i32_1 = arith.constant 0 : i32
    return %c0_i32, %c0_i32_0 : i32, i32
  }
  func.func @transform_9(%arg0: i32) -> (i32, i32) {
    %c0_i32 = arith.constant 0 : i32
    %c0_i32_0 = arith.constant 0 : i32
    return %arg0, %c0_i32 : i32, i32
  }
}

</mosaic_0001>

<bundles_post_ra>
// kernel: net_forward.1
= control target key start
LH: loop header
LB: loop body
LE: loop exit
PB: predicated region body
PF: predicated region fallthrough
CT: control target
= control target key end

     0   :  { %14 = vsyncpa [#allocation3], 0  ;;  %s1597_s0 = inlined_call_operand.vmem [shape: bf16[32,32], index: 0, kind: input, shape index: {}]   ;;  %s1598_s1 = inlined_call_operand.vmem [shape: bf16[32,256], index: 1, kind: input, shape index: {}]   ;;  %s1599_s2 = inlined_call_operand.vmem [shape: f32[1,256], index: 2, kind: input, shape index: {}]   ;;  %s1600_s3 = inlined_call_operand.hbm [shape: bf16[256,256], index: 3, kind: input, shape index: {}]   ;;  %s1601_s4 = inlined_call_operand.vmem [shape: f32[1,256], index: 4, kind: input, shape index: {}]   ;;  %s1602_s5 = inlined_call_operand.hbm [shape: bf16[256,256], index: 5, kind: input, shape index: {}]   ;;  %s1603_s6 = inlined_call_operand.vmem [shape: f32[1,256], index: 6, kind: input, shape index: {}]   ;;  %s1604_s7 = inlined_call_operand.hbm [shape: bf16[256,128], index: 7, kind: input, shape index: {}]   ;;  %s1605_s8 = inlined_call_operand.vmem [shape: f32[1,128], index: 8, kind: input, shape index: {}]   ;;  %s1606_s9 = inlined_call_operand.vmem [shape: f32[32,128], index: 9, kind: output, shape index: {}]  }
   0x1   :  { %15 = vsyncpa [#allocation5], 0  ;;  %s41_s11 = sshll.u32 %s1602_s5, 4  ;;  %s1467_s12 = smov [#allocation4]   ;;  %s42_s11 = int_to_ptr.hbm [resolvable:$true] %s41_s11 }
   0x2   :  { %s43_s13 = sshll.u32 %s1467_s12, 4  ;;  %s26_s16 = sshll.u32 %s1600_s3, 4  ;;  %s44_s13 = int_to_ptr.vmem [resolvable:$true] %s43_s13  ;;  %s27_s16 = int_to_ptr.hbm [resolvable:$true] %s26_s16 }
   0x3   :  { %s1468_s17 = smov 128   ;;  %s1469_s18 = smov 8  }
   0x4   :  { %49 = dma.hbm_to_vmem [thread:$0]  %s42_s11, 4096, %s44_s13, [#allocation5], %s1468_s17, %s1468_s17, %s1469_s18  }
   0x5   :  { %s1470_s19 = smov [#allocation2]   ;;  %s56_s23 = sshll.u32 %s1604_s7, 4  ;;  %s57_s23 = int_to_ptr.hbm [resolvable:$true] %s56_s23 }
   0x6   :  { %s28_s20 = sshll.u32 %s1470_s19, 4  ;;  %s1471_s5 = smov [#allocation6]   ;;  %s29_s20 = int_to_ptr.vmem [resolvable:$true] %s28_s20 }
   0x7   :  { %34 = dma.hbm_to_vmem [thread:$0]  %s27_s16, 4096, %s29_s20, [#allocation3], %s1468_s17, %s1468_s17, %s1469_s18  }
   0x8   :  { %s58_s24 = sshll.u32 %s1471_s5, 4  ;;  %s1472_s25 = smov 64   ;;  %s59_s24 = int_to_ptr.vmem [resolvable:$true] %s58_s24 }
   0x9   :  { %s1473_s26 = smov 4  }
   0xa   :  { %64 = dma.hbm_to_vmem [thread:$0]  %s57_s23, 2048, %s59_s24, [#allocation5], %s1472_s25, %s1472_s25, %s1473_s26  }
   0xb   :  { %1463 = dma.done.wait [#allocation3], 4096  }
   0xc   :  { %1464 = vsyncadd [#allocation3], 4294963200 }
   0xd   :  { %1465 = dma.done.wait [#allocation5], 6144  }
   0xe   :  { %1466 = vsyncadd [#allocation5], 4294961152  ;;  %v951_v0 = vld [vmem:[%s1598_s1 + $0x10] sm:$0xf]  ;;  %v1286_v1 = vld [vmem:[%s1598_s1 + $0x14] sm:$0xf0] }
   0xf   :  { %v1285_v2 = vld [vmem:[%s1598_s1 + $0x14] sm:$0xf]  ;;  %v952_v3 = vor.u32 %v1286_v1, %v951_v0  ;;  %v953_v4 = vld [vmem:[%s1598_s1 + $0x18] sm:$0xf0]  ;;  %v943_v5 = vld [vmem:[%s1598_s1] sm:$0xf] }
  0x10   :  { %v1284_v6 = vld [vmem:[%s1598_s1 + $0x4] sm:$0xf0]  ;;  %v956_v7 = vor.u32 %v1285_v2, %v953_v4  ;;  %v1283_v8 = vld [vmem:[%s1598_s1 + $0x4] sm:$0xf]  ;;  %v945_v9 = vld [vmem:[%s1598_s1 + $0x8] sm:$0xf0] }
  0x11   :  { %137 = vmatpush.bf16.msra.mxu0 %v952_v3  ;;  %v944_v10 = vor.u32 %v1284_v6, %v943_v5  ;;  %vm124_vm0 = vcmask 261120   ;;  %v1019_v11 = vld [vmem:[#allocation2 + $0x70] sm:$0xf]  ;;  %v1302_v12 = vld [vmem:[#allocation2 + $0x74] sm:$0xf0]  ;;  %v948_v13 = vor.u32 %v1283_v8, %v945_v9  ;;  %v1281_v14 = vld [vmem:[%s1597_s0] sm:$0xff] }
  0x12   :  { %156 = vmatpush.bf16.msra.mxu1 %v956_v7  ;;  %v1020_v15 = vor.u32 %v1302_v12, %v1019_v11  ;;  %v1083_v16 = vld [vmem:[#allocation2 + $0xf0] sm:$0xf]  ;;  %v1318_v17 = vld [vmem:[#allocation2 + $0xf4] sm:$0xf0]  ;;  %v1301_v18 = vld [vmem:[#allocation2 + $0x74] sm:$0xf] }
  0x13   :  { %v1084_v19 = vor.u32 %v1318_v17, %v1083_v16  ;;  %v1021_v20 = vld [vmem:[#allocation2 + $0x78] sm:$0xf0]  ;;  %v1317_v21 = vld [vmem:[#allocation2 + $0xf4] sm:$0xf]  ;;  %v1011_v25 = vld [vmem:[#allocation2 + $0x60] sm:$0xf] }
  0x14   :  { %v1085_v22 = vld [vmem:[#allocation2 + $0xf8] sm:$0xf0]  ;;  %379 = vmatpush.bf16.msra.mxu2 %v1020_v15  ;;  %v1024_v23 = vor.u32 %v1301_v18, %v1021_v20  ;;  %v1300_v26 = vld [vmem:[#allocation2 + $0x64] sm:$0xf0]  ;;  %v1075_v27 = vld [vmem:[#allocation2 + $0xe0] sm:$0xf] }
  0x15   :  { %v1088_v24 = vor.u32 %v1317_v21, %v1085_v22  ;;  %138 = vmatpush.bf16.msra.mxu0 %v944_v10  ;;  %398 = vmatpush.bf16.msra.mxu3 %v1084_v19  ;;  %v1012_v28 = vor.u32 %v1300_v26, %v1011_v25  ;;  %v1316_v29 = vld [vmem:[#allocation2 + $0xe4] sm:$0xf0]  ;;  %v1299_v30 = vld [vmem:[#allocation2 + $0x64] sm:$0xf]  ;;  %v1013_v31 = vld [vmem:[#allocation2 + $0x68] sm:$0xf0] }
  0x16   :  { %157 = vmatpush.bf16.msra.mxu1 %v948_v13  ;;  %v1076_v32 = vor.u32 %v1316_v29, %v1075_v27  ;;  %v1016_v33 = vor.u32 %v1299_v30, %v1013_v31  ;;  %v1315_v34 = vld [vmem:[#allocation2 + $0xe4] sm:$0xf]  ;;  %v1077_v35 = vld [vmem:[#allocation2 + $0xe8] sm:$0xf0]  ;;  %v1003_v36 = vld [vmem:[#allocation2 + $0x50] sm:$0xf] }
  0x17   :  { %v1080_v37 = vor.u32 %v1315_v34, %v1077_v35  ;;  %v1298_v38 = vld [vmem:[#allocation2 + $0x54] sm:$0xf0]  ;;  %v1067_v39 = vld [vmem:[#allocation2 + $0xd0] sm:$0xf]  ;;  %v1297_v42 = vld [vmem:[#allocation2 + $0x54] sm:$0xf] }
  0x18   :  { %v1314_v40 = vld [vmem:[#allocation2 + $0xd4] sm:$0xf0]  ;;  %957 = vmatmul.msk.bf16.vlgmr.msra.gmra.mxu0 %vm124_vm0, %v1281_v14  ;;  %380 = vmatpush.bf16.msra.mxu2 %v1012_v28  ;;  %v1004_v41 = vor.u32 %v1298_v38, %v1003_v36  ;;  %v1005_v43 = vld [vmem:[#allocation2 + $0x58] sm:$0xf0]  ;;  %v1313_v44 = vld [vmem:[#allocation2 + $0xd4] sm:$0xf] }
  0x19   :  { %417 = vmatpush.bf16.msrb.mxu0 %v1024_v23  ;;  %959 = vmatmul.msk.bf16.vlgmr.msra.gmra.mxu1 %vm124_vm0, %v1281_v14  ;;  %v1068_v45 = vor.u32 %v1314_v40, %v1067_v39  ;;  %v1069_v46 = vld [vmem:[#allocation2 + $0xd8] sm:$0xf0]  ;;  %v995_v47 = vld [vmem:[#allocation2 + $0x40] sm:$0xf]  ;;  %v1296_v48 = vld [vmem:[#allocation2 + $0x44] sm:$0xf0]  ;;  %v1008_v49 = vor.u32 %v1297_v42, %v1005_v43 }
  0x1a   :  { %436 = vmatpush.bf16.msrb.mxu1 %v1088_v24  ;;  %399 = vmatpush.bf16.msra.mxu3 %v1076_v32  ;;  %v1059_v50 = vld [vmem:[#allocation2 + $0xc0] sm:$0xf]  ;;  %v1312_v51 = vld [vmem:[#allocation2 + $0xc4] sm:$0xf0]  ;;  %v1072_v52 = vor.u32 %v1313_v44, %v1069_v46  ;;  %v1295_v53 = vld [vmem:[#allocation2 + $0x44] sm:$0xf]  ;;  %v996_v55 = vor.u32 %v1296_v48, %v995_v47 }
  0x1b   :  { %v997_v54 = vld [vmem:[#allocation2 + $0x48] sm:$0xf0]  ;;  %v1311_v56 = vld [vmem:[#allocation2 + $0xc4] sm:$0xf]  ;;  %v1060_v58 = vor.u32 %v1312_v51, %v1059_v50  ;;  %v987_v62 = vld [vmem:[#allocation2 + $0x30] sm:$0xf] }
  0x1c   :  { %381 = vmatpush.bf16.msra.mxu2 %v1004_v41  ;;  %v1061_v57 = vld [vmem:[#allocation2 + $0xc8] sm:$0xf0]  ;;  %v1000_v59 = vor.u32 %v1295_v53, %v997_v54  ;;  %v1294_v63 = vld [vmem:[#allocation2 + $0x34] sm:$0xf0]  ;;  %v1051_v0 = vld [vmem:[#allocation2 + $0xb0] sm:$0xf] }
  0x1d   :  { %418 = vmatpush.bf16.msrb.mxu0 %v1016_v33  ;;  %v1064_v60 = vor.u32 %v1311_v56, %v1061_v57  ;;  %v1282_v61 = vld [vmem:[%s1597_s0 + $0x8] sm:$0xff]  ;;  %v988_v1 = vor.u32 %v1294_v63, %v987_v62  ;;  %v1310_v2 = vld [vmem:[#allocation2 + $0xb4] sm:$0xf0]  ;;  %v1293_v3 = vld [vmem:[#allocation2 + $0x34] sm:$0xf] }
  0x1e   :  { %437 = vmatpush.bf16.msrb.mxu1 %v1080_v37  ;;  %400 = vmatpush.bf16.msra.mxu3 %v1068_v45  ;;  %v989_v4 = vld [vmem:[#allocation2 + $0x38] sm:$0xf0]  ;;  %v1052_v5 = vor.u32 %v1310_v2, %v1051_v0  ;;  %v1309_v7 = vld [vmem:[#allocation2 + $0xb4] sm:$0xf]  ;;  %v979_v10 = vld [vmem:[#allocation2 + $0x20] sm:$0xf] }
  0x1f   :  { %v992_v6 = vor.u32 %v1293_v3, %v989_v4  ;;  %v1053_v8 = vld [vmem:[#allocation2 + $0xb8] sm:$0xf0]  ;;  %v1292_v11 = vld [vmem:[#allocation2 + $0x24] sm:$0xf0]  ;;  %v1043_v13 = vld [vmem:[#allocation2 + $0xa0] sm:$0xf] }
  0x20   :  { %382 = vmatpush.bf16.msra.mxu2 %v996_v55  ;;  %v1056_v9 = vor.u32 %v1309_v7, %v1053_v8  ;;  %v980_v12 = vor.u32 %v1292_v11, %v979_v10  ;;  %v1308_v14 = vld [vmem:[#allocation2 + $0xa4] sm:$0xf0]  ;;  %v1291_v15 = vld [vmem:[#allocation2 + $0x24] sm:$0xf]  ;;  %v981_v17 = vld [vmem:[#allocation2 + $0x28] sm:$0xf0] }
  0x21   :  { %419 = vmatpush.bf16.msrb.mxu0 %v1008_v49  ;;  %v1044_v16 = vor.u32 %v1308_v14, %v1043_v13  ;;  %v1307_v18 = vld [vmem:[#allocation2 + $0xa4] sm:$0xf]  ;;  %v1045_v19 = vld [vmem:[#allocation2 + $0xa8] sm:$0xf0]  ;;  %v984_v20 = vor.u32 %v1291_v15, %v981_v17  ;;  %v971_v22 = vld [vmem:[#allocation2 + $0x10] sm:$0xf] }
  0x22   :  { %438 = vmatpush.bf16.msrb.mxu1 %v1072_v52  ;;  %401 = vmatpush.bf16.msra.mxu3 %v1060_v58  ;;  %v1048_v21 = vor.u32 %v1307_v18, %v1045_v19  ;;  %v1290_v23 = vld [vmem:[#allocation2 + $0x14] sm:$0xf0]  ;;  %v1035_v24 = vld [vmem:[#allocation2 + $0x90] sm:$0xf]  ;;  %v1289_v27 = vld [vmem:[#allocation2 + $0x14] sm:$0xf] }
  0x23   :  { %v972_v25 = vor.u32 %v1290_v23, %v971_v22  ;;  %v1306_v26 = vld [vmem:[#allocation2 + $0x94] sm:$0xf0]  ;;  %v973_v28 = vld [vmem:[#allocation2 + $0x18] sm:$0xf0]  ;;  %v1305_v31 = vld [vmem:[#allocation2 + $0x94] sm:$0xf] }
  0x24   :  { %383 = vmatpush.bf16.msra.mxu2 %v988_v1  ;;  %v1036_v29 = vor.u32 %v1306_v26, %v1035_v24  ;;  %v976_v30 = vor.u32 %v1289_v27, %v973_v28  ;;  %v1037_v32 = vld [vmem:[#allocation2 + $0x98] sm:$0xf0]  ;;  %v963_v34 = vld [vmem:[#allocation2] sm:$0xf]  ;;  %v1288_v35 = vld [vmem:[#allocation2 + $0x4] sm:$0xf0] }
  0x25   :  { %420 = vmatpush.bf16.msrb.mxu0 %v1000_v59  ;;  %v1040_v33 = vor.u32 %v1305_v31, %v1037_v32  ;;  %v1027_v36 = vld [vmem:[#allocation2 + $0x80] sm:$0xf]  ;;  %v964_v37 = vor.u32 %v1288_v35, %v963_v34  ;;  %v1304_v38 = vld [vmem:[#allocation2 + $0x84] sm:$0xf0]  ;;  %v1287_v39 = vld [vmem:[#allocation2 + $0x4] sm:$0xf] }
  0x26   :  { %439 = vmatpush.bf16.msrb.mxu1 %v1064_v60  ;;  %402 = vmatpush.bf16.msra.mxu3 %v1052_v5  ;;  %v965_v40 = vld [vmem:[#allocation2 + $0x8] sm:$0xf0]  ;;  %v1028_v41 = vor.u32 %v1304_v38, %v1027_v36  ;;  %v1303_v43 = vld [vmem:[#allocation2 + $0x84] sm:$0xf]  ;;  %v88_v46 = vld [vmem:[%s1599_s2] sm:$0x3] }
  0x27   :  { %v968_v42 = vor.u32 %v1287_v39, %v965_v40  ;;  %v1029_v44 = vld [vmem:[#allocation2 + $0x88] sm:$0xf0]  ;;  %v1211_v48 = vld [vmem:[#allocation4 + $0xf0] sm:$0xf]  ;;  %v1350_v49 = vld [vmem:[#allocation4 + $0xf4] sm:$0xf0] }
  0x28   :  { %958 = vmatmul.msk.bf16.gmra.mxu0 %vm124_vm0, %v1282_v61  ;;  %384 = vmatpush.bf16.msra.mxu2 %v980_v12  ;;  %v1032_v45 = vor.u32 %v1303_v43, %v1029_v44  ;;  %v1349_v50 = vld [vmem:[#allocation4 + $0xf4] sm:$0xf]  ;;  %v1212_v52 = vor.u32 %v1350_v49, %v1211_v48  ;;  %v1213_v53 = vld [vmem:[#allocation4 + $0xf8] sm:$0xf0]  ;;  %v1203_v54 = vld [vmem:[#allocation4 + $0xe0] sm:$0xf] }
  0x29   :  { %960 = vmatmul.msk.bf16.gmra.mxu1 %vm124_vm0, %v1282_v61  ;;  %421 = vmatpush.bf16.msrb.mxu0 %v992_v6  ;;  %v1348_v55 = vld [vmem:[#allocation4 + $0xe4] sm:$0xf0]  ;;  %v1216_v56 = vor.u32 %v1349_v50, %v1213_v53  ;;  %v1347_v57 = vld [vmem:[#allocation4 + $0xe4] sm:$0xf]  ;;  %v1205_v58 = vld [vmem:[#allocation4 + $0xe8] sm:$0xf0] }
  0x2a   :  { %440 = vmatpush.bf16.msrb.mxu1 %v1056_v9  ;;  %403 = vmatpush.bf16.msra.mxu3 %v1044_v16  ;;  %v1147_v59 = vld [vmem:[#allocation4 + $0x70] sm:$0xf]  ;;  %v1570_v60 = vperm.slane %v88_v46, 0  ;;  %v1204_v61 = vor.u32 %v1348_v55, %v1203_v54  ;;  %v1334_v62 = vld [vmem:[#allocation4 + $0x74] sm:$0xf0]  ;;  %v91_v0 = vperm.slane %v88_v46, 1  ;;  %v1208_v1 = vor.u32 %v1347_v57, %v1205_v58 }
  0x2b   :  { %v1333_v63 = vld [vmem:[#allocation4 + $0x74] sm:$0xf]  ;;  %v1148_v2 = vor.u32 %v1334_v62, %v1147_v59  ;;  %v1149_v3 = vld [vmem:[#allocation4 + $0x78] sm:$0xf0]  ;;  %v1195_v4 = vld [vmem:[#allocation4 + $0xd0] sm:$0xf] }
  0x2c   :  { %385 = vmatpush.bf16.msra.mxu2 %v972_v25  ;;  %v1152_v5 = vor.u32 %v1333_v63, %v1149_v3  ;;  %v1346_v6 = vld [vmem:[#allocation4 + $0xd4] sm:$0xf0]  ;;  %v1345_v7 = vld [vmem:[#allocation4 + $0xd4] sm:$0xf]  ;;  %v1197_v8 = vld [vmem:[#allocation4 + $0xd8] sm:$0xf0] }
  0x2d   :  { %422 = vmatpush.bf16.msrb.mxu0 %v984_v20  ;;  %v1139_v9 = vld [vmem:[#allocation4 + $0x60] sm:$0xf]  ;;  %v1332_v10 = vld [vmem:[#allocation4 + $0x64] sm:$0xf0]  ;;  %v1331_v11 = vld [vmem:[#allocation4 + $0x64] sm:$0xf]  ;;  %v1196_v13 = vor.u32 %v1346_v6, %v1195_v4  ;;  %v1200_v18 = vor.u32 %v1345_v7, %v1197_v8 }
  0x2e   :  { %441 = vmatpush.bf16.msrb.mxu1 %v1048_v21  ;;  %404 = vmatpush.bf16.msra.mxu3 %v1036_v29  ;;  %v1140_v14 = vor.u32 %v1332_v10, %v1139_v9  ;;  %v1141_v15 = vld [vmem:[#allocation4 + $0x68] sm:$0xf0]  ;;  %v1131_v20 = vld [vmem:[#allocation4 + $0x50] sm:$0xf]  ;;  %v1187_v23 = vld [vmem:[#allocation4 + $0xc0] sm:$0xf] }
  0x2f   :  { %v1144_v19 = vor.u32 %v1331_v11, %v1141_v15  ;;  %v1330_v24 = vld [vmem:[#allocation4 + $0x54] sm:$0xf0]  ;;  %v1344_v26 = vld [vmem:[#allocation4 + $0xc4] sm:$0xf0]  ;;  %v1343_v27 = vld [vmem:[#allocation4 + $0xc4] sm:$0xf] }
  0x30   :  { %386 = vmatpush.bf16.msra.mxu2 %v964_v37  ;;  %v1189_v28 = vld [vmem:[#allocation4 + $0xc8] sm:$0xf0]  ;;  %v1132_v29 = vor.u32 %v1330_v24, %v1131_v20  ;;  %v1188_v35 = vor.u32 %v1344_v26, %v1187_v23  ;;  %v1133_v53 = vld [vmem:[#allocation4 + $0x58] sm:$0xf0]  ;;  %v1179_v55 = vld [vmem:[#allocation4 + $0xb0] sm:$0xf] }
  0x31   :  { %423 = vmatpush.bf16.msrb.mxu0 %v976_v30  ;;  %v1192_v36 = vor.u32 %v1343_v27, %v1189_v28  ;;  %v1341_v57 = vld [vmem:[#allocation4 + $0xb4] sm:$0xf]  ;;  %v1181_v59 = vld [vmem:[#allocation4 + $0xb8] sm:$0xf0]  ;;  %v1328_v62 = vld [vmem:[#allocation4 + $0x44] sm:$0xf0] }
  0x32   :  { %442 = vmatpush.bf16.msrb.mxu1 %v1040_v33  ;;  %405 = vmatpush.bf16.msra.mxu3 %v1028_v41  ;;  %v1327_v63 = vld [vmem:[#allocation4 + $0x44] sm:$0xf]  ;;  %v1171_v3 = vld [vmem:[#allocation4 + $0xa0] sm:$0xf]  ;;  %v1340_v4 = vld [vmem:[#allocation4 + $0xa4] sm:$0xf0] }
  0x33   :  { %v1172_v6 = vor.u32 %v1340_v4, %v1171_v3  ;;  %v1173_v7 = vld [vmem:[#allocation4 + $0xa8] sm:$0xf0]  ;;  %v1115_v9 = vld [vmem:[#allocation4 + $0x30] sm:$0xf]  ;;  %v1326_v10 = vld [vmem:[#allocation4 + $0x34] sm:$0xf0] }
  0x34   :  { %665 = vmatpush.bf16.msrb.mxu2 %v1148_v2  ;;  %v1325_v11 = vld [vmem:[#allocation4 + $0x34] sm:$0xf]  ;;  %v1163_v15 = vld [vmem:[#allocation4 + $0x90] sm:$0xf]  ;;  %v1323_v23 = vld [vmem:[#allocation4 + $0x24] sm:$0xf] }
  0x35   :  { %424 = vmatpush.bf16.msrb.mxu0 %v968_v42  ;;  %v1155_v27 = vld [vmem:[#allocation4 + $0x80] sm:$0xf]  ;;  %v1336_v28 = vld [vmem:[#allocation4 + $0x84] sm:$0xf0] }
  0x36   :  { %443 = vmatpush.bf16.msrb.mxu1 %v1032_v45  ;;  %684 = vmatpush.bf16.msrb.mxu3 %v1212_v52  ;;  %v1329_v52 = vld [vmem:[#allocation4 + $0x54] sm:$0xf] }
  0x37   :  { %v1136_v54 = vor.u32 %v1329_v52, %v1133_v53  ;;  %v1366_v53 = vld [vmem:[#allocation6 + $0x78] sm:$0xff] }
  0x38   :  { %666 = vmatpush.bf16.msrb.mxu2 %v1140_v14 }
  0x39   :  { %703 = vmatpush.bf16.msra.mxu0 %v1152_v5  ;;  %v1339_v5 = vld [vmem:[#allocation4 + $0xa4] sm:$0xf] }
  0x3a   :  { %722 = vmatpush.bf16.msra.mxu1 %v1216_v56  ;;  %685 = vmatpush.bf16.msrb.mxu3 %v1204_v61  ;;  %v1342_v56 = vld [vmem:[#allocation4 + $0xb4] sm:$0xf0]  ;;  %v1123_v61 = vld [vmem:[#allocation4 + $0x40] sm:$0xf]  ;;  %v1176_v8 = vor.u32 %v1339_v5, %v1173_v7 }
  0x3b   :  { %v1180_v58 = vor.u32 %v1342_v56, %v1179_v55 }
  0x3c   :  { %667 = vmatpush.bf16.msrb.mxu2 %v1132_v29  ;;  %v1335_v29 = vld [vmem:[#allocation4 + $0x84] sm:$0xf] }
  0x3d   :  { %704 = vmatpush.bf16.msra.mxu0 %v1144_v19  ;;  %v1165_v19 = vld [vmem:[#allocation4 + $0x98] sm:$0xf0] }
  0x3e   :  { %723 = vmatpush.bf16.msra.mxu1 %v1208_v1  ;;  %686 = vmatpush.bf16.msrb.mxu3 %v1196_v13  ;;  %v1125_v1 = vld [vmem:[#allocation4 + $0x48] sm:$0xf0]  ;;  %v1117_v13 = vld [vmem:[#allocation4 + $0x38] sm:$0xf0] }
  0x3f   :  { %v1128_v2 = vor.u32 %v1327_v63, %v1125_v1  ;;  %v1120_v14 = vor.u32 %v1325_v11, %v1117_v13 }
  0x41   :  { %705 = vmatpush.bf16.msra.mxu0 %v1136_v54  ;;  %v1358_v54 = vld [vmem:[#allocation6 + $0x38] sm:$0xff] }
  0x42   :  { %724 = vmatpush.bf16.msra.mxu1 %v1200_v18  ;;  %687 = vmatpush.bf16.msrb.mxu3 %v1188_v35  ;;  %v1321_v35 = vld [vmem:[#allocation4 + $0x14] sm:$0xf] }
  0x45   :  { %706 = vmatpush.bf16.msra.mxu0 %v1128_v2 }
  0x46   :  { %725 = vmatpush.bf16.msra.mxu1 %v1192_v36  ;;  %688 = vmatpush.bf16.msrb.mxu3 %v1180_v58 }
  0x49   :  { %707 = vmatpush.bf16.msra.mxu0 %v1120_v14 }
  0x4a   :  { %689 = vmatpush.bf16.msrb.mxu3 %v1172_v6 }
  0x95   :  { %v140_v47 = vpop.f32.mrf.mxu0 }
  0x96   :  { %v159_v51 = vpop.f32.mrf.mxu1  ;;  %v141_v12 = vadd.f32 %v140_v47, %v1570_v60 }
  0x97   :  { %v160_v16 = vadd.f32 %v159_v51, %v91_v0 }
  0x98   :  { %v169_v30 = vmax.f32 %v141_v12, 0.0  ;;  %v1116_v12 = vor.u32 %v1326_v10, %v1115_v9 }
  0x99   :  { %v170_v32 = vmax.f32 %v160_v16, 0.0  ;;  %v1338_v16 = vld [vmem:[#allocation4 + $0x94] sm:$0xf0] }
  0x9a   :  { %v1164_v18 = vor.u32 %v1338_v16, %v1163_v15 }
  0x9c   :  { %690 = vmatpush.bf16.msrb.mxu3 %v1164_v18 }
  0x9d   :  { %v142_v17 = vpop.f32.mrf.mxu0 }
  0x9e   :  { %v143_v21 = vadd.f32 %v142_v17, %v1570_v60  ;;  %v161_v22 = vpop.f32.mrf.mxu1  ;;  %v1337_v17 = vld [vmem:[#allocation4 + $0x94] sm:$0xf] }
  0x9f   :  { %v162_v25 = vadd.f32 %v161_v22, %v91_v0  ;;  %v1168_v20 = vor.u32 %v1337_v17, %v1165_v19  ;;  %v1324_v22 = vld [vmem:[#allocation4 + $0x24] sm:$0xf0] }
  0xa0   :  { %v171_v31 = vmax.f32 %v143_v21, 0.0  ;;  %v1107_v21 = vld [vmem:[#allocation4 + $0x20] sm:$0xf] }
  0xa1   :  { %v172_v33 = vmax.f32 %v162_v25, 0.0  ;;  %v1108_v24 = vor.u32 %v1324_v22, %v1107_v21  ;;  %v1109_v25 = vld [vmem:[#allocation4 + $0x28] sm:$0xf0] }
  0xa2   :  { %v177_v34 = vpack.c.bf16 %v171_v31, %v169_v30  ;;  %v1112_v26 = vor.u32 %v1323_v23, %v1109_v25  ;;  %v1156_v30 = vor.u32 %v1336_v28, %v1155_v27  ;;  %v1157_v31 = vld [vmem:[#allocation4 + $0x88] sm:$0xf0] }
  0xa3   :  { %v178_v37 = vpack.c.bf16 %v172_v33, %v170_v32  ;;  %v1160_v32 = vor.u32 %v1335_v29, %v1157_v31  ;;  %v1099_v33 = vld [vmem:[#allocation4 + $0x10] sm:$0xf]  ;;  %v1364_v31 = vld [vmem:[#allocation6 + $0x68] sm:$0xff] }
  0xa4   :  { %387 = vmatmul.bf16.vlgmr.msra.gmra.mxu2 %v177_v34  ;;  %425 = vmatmul.bf16.vlgmr.msrb.gmra.mxu0 %v177_v34  ;;  %v1322_v34 = vld [vmem:[#allocation4 + $0x14] sm:$0xf0] }
  0xa5   :  { %406 = vmatmul.bf16.vlgmr.msra.gmra.mxu3 %v178_v37  ;;  %444 = vmatmul.bf16.vlgmr.msrb.gmra.mxu1 %v178_v37  ;;  %v145_v38 = vpop.f32.mrf.mxu0  ;;  %v1100_v36 = vor.u32 %v1322_v34, %v1099_v33  ;;  %v1101_v37 = vld [vmem:[#allocation4 + $0x18] sm:$0xf0]  ;;  %v1363_v33 = vld [vmem:[#allocation6 + $0x60] sm:$0xff]  ;;  %v1356_v34 = vld [vmem:[#allocation6 + $0x28] sm:$0xff] }
  0xa6   :  { %v164_v39 = vpop.f32.mrf.mxu1  ;;  %v146_v40 = vadd.f32 %v145_v38, %v1570_v60  ;;  %708 = vmatpush.bf16.msra.mxu0 %v1112_v26  ;;  %691 = vmatpush.bf16.msrb.mxu3 %v1156_v30  ;;  %v1104_v38 = vor.u32 %v1321_v35, %v1101_v37  ;;  %v1362_v35 = vld [vmem:[#allocation6 + $0x58] sm:$0xff]  ;;  %v1361_v37 = vld [vmem:[#allocation6 + $0x50] sm:$0xff] }
  0xa7   :  { %v165_v41 = vadd.f32 %v164_v39, %v91_v0  ;;  %v1091_v39 = vld [vmem:[#allocation4] sm:$0xf] }
  0xa8   :  { %v173_v46 = vmax.f32 %v146_v40, 0.0  ;;  %v1320_v40 = vld [vmem:[#allocation4 + $0x4] sm:$0xf0] }
  0xa9   :  { %v174_v48 = vmax.f32 %v165_v41, 0.0  ;;  %v1319_v41 = vld [vmem:[#allocation4 + $0x4] sm:$0xf] }
  0xaa   :  { %709 = vmatpush.bf16.msra.mxu0 %v1104_v38  ;;  %1375 = vmatpush.bf16.msra.mxu3 %v1366_v53  ;;  %v1354_v38 = vld [vmem:[#allocation6 + $0x18] sm:$0xff] }
  0xad   :  { %v147_v42 = vpop.f32.mrf.mxu0 }
  0xae   :  { %v148_v43 = vadd.f32 %v147_v42, %v1570_v60  ;;  %v166_v44 = vpop.f32.mrf.mxu1  ;;  %v1184_v60 = vor.u32 %v1341_v57, %v1181_v59  ;;  %v1092_v42 = vor.u32 %v1320_v40, %v1091_v39  ;;  %v1365_v59 = vld [vmem:[#allocation6 + $0x70] sm:$0xff]  ;;  %v1360_v39 = vld [vmem:[#allocation6 + $0x48] sm:$0xff] }
  0xaf   :  { %v167_v45 = vadd.f32 %v166_v44, %v91_v0  ;;  %v1124_v0 = vor.u32 %v1328_v62, %v1123_v61  ;;  %1376 = vmatpush.bf16.msra.mxu3 %v1365_v59  ;;  %v1353_v40 = vld [vmem:[#allocation6 + $0x10] sm:$0xff] }
  0xb0   :  { %v175_v47 = vmax.f32 %v148_v43, 0.0  ;;  %726 = vmatpush.bf16.msra.mxu1 %v1184_v60  ;;  %v1093_v43 = vld [vmem:[#allocation4 + $0x8] sm:$0xf0] }
  0xb1   :  { %v176_v49 = vmax.f32 %v167_v45, 0.0  ;;  %668 = vmatpush.bf16.msrb.mxu2 %v1124_v0  ;;  %v1096_v44 = vor.u32 %v1319_v41, %v1093_v43  ;;  %v213_v45 = vld [vmem:[%s1601_s4] sm:$0x3] }
  0xb2   :  { %v179_v50 = vpack.c.bf16 %v175_v47, %v173_v46  ;;  %v216_v47 = vperm.slane %v213_v45, 1  ;;  %v1359_v41 = vld [vmem:[#allocation6 + $0x40] sm:$0xff] }
  0xb3   :  { %v180_v51 = vpack.c.bf16 %v176_v49, %v174_v48  ;;  %710 = vmatpush.bf16.msra.mxu0 %v1096_v44  ;;  %1377 = vmatpush.bf16.msra.mxu3 %v1364_v31  ;;  %v1351_v43 = vld [vmem:[#allocation6] sm:$0xff] }
  0xb4   :  { %392 = vmatmul.bf16.gmra.mxu2 %v179_v50  ;;  %430 = vmatmul.bf16.gmra.mxu0 %v179_v50 }
  0xb5   :  { %411 = vmatmul.bf16.gmra.mxu3 %v180_v51  ;;  %449 = vmatmul.bf16.gmra.mxu1 %v180_v51  ;;  %v215_v51 = vperm.slane %v213_v45, 0  ;;  %v499_v45 = vld [vmem:[%s1603_s6] sm:$0x3] }
  0xb6   :  { %727 = vmatpush.bf16.msra.mxu1 %v1176_v8  ;;  %669 = vmatpush.bf16.msrb.mxu2 %v1116_v12 }
  0xb7   :  { %885 = vmatpush.bf16.msrb.mxu0 %v1358_v54  ;;  %1378 = vmatpush.bf16.msra.mxu3 %v1363_v33 }
  0xba   :  { %728 = vmatpush.bf16.msra.mxu1 %v1168_v20  ;;  %670 = vmatpush.bf16.msrb.mxu2 %v1108_v24 }
  0xbb   :  { %1379 = vmatpush.bf16.msra.mxu3 %v1362_v35 }
  0xbe   :  { %729 = vmatpush.bf16.msra.mxu1 %v1160_v32  ;;  %671 = vmatpush.bf16.msrb.mxu2 %v1100_v36  ;;  %v1357_v32 = vld [vmem:[#allocation6 + $0x30] sm:$0xff]  ;;  %v1355_v36 = vld [vmem:[#allocation6 + $0x20] sm:$0xff] }
  0xbf   :  { %886 = vmatpush.bf16.msrb.mxu0 %v1357_v32  ;;  %1380 = vmatpush.bf16.msra.mxu3 %v1361_v37 }
  0xc2   :  { %672 = vmatpush.bf16.msrb.mxu2 %v1092_v42  ;;  %904 = vmatpush.bf16.msrb.mxu1 %v1366_v53  ;;  %v1352_v42 = vld [vmem:[#allocation6 + $0x8] sm:$0xff] }
  0xc3   :  { %887 = vmatpush.bf16.msrb.mxu0 %v1356_v34  ;;  %1381 = vmatpush.bf16.msra.mxu3 %v1360_v39 }
  0xc6   :  { %1367 = vmatpush.bf16.msra.mxu2 %v1358_v54  ;;  %905 = vmatpush.bf16.msrb.mxu1 %v1365_v59 }
  0xc7   :  { %888 = vmatpush.bf16.msrb.mxu0 %v1355_v36  ;;  %1382 = vmatpush.bf16.msra.mxu3 %v1359_v41 }
  0xca   :  { %906 = vmatpush.bf16.msrb.mxu1 %v1364_v31  ;;  %1368 = vmatpush.bf16.msra.mxu2 %v1357_v32 }
  0xcb   :  { %889 = vmatpush.bf16.msrb.mxu0 %v1354_v38 }
  0xce   :  { %907 = vmatpush.bf16.msrb.mxu1 %v1363_v33  ;;  %1369 = vmatpush.bf16.msra.mxu2 %v1356_v34 }
  0xcf   :  { %890 = vmatpush.bf16.msrb.mxu0 %v1353_v40 }
  0xd2   :  { %908 = vmatpush.bf16.msrb.mxu1 %v1362_v35  ;;  %1370 = vmatpush.bf16.msra.mxu2 %v1355_v36 }
  0xd3   :  { %891 = vmatpush.bf16.msrb.mxu0 %v1352_v42 }
  0xd6   :  { %909 = vmatpush.bf16.msrb.mxu1 %v1361_v37  ;;  %1371 = vmatpush.bf16.msra.mxu2 %v1354_v38 }
  0xd7   :  { %892 = vmatpush.bf16.msrb.mxu0 %v1351_v43 }
  0xda   :  { %910 = vmatpush.bf16.msrb.mxu1 %v1360_v39  ;;  %1372 = vmatpush.bf16.msra.mxu2 %v1353_v40 }
  0xde   :  { %911 = vmatpush.bf16.msrb.mxu1 %v1359_v41  ;;  %1373 = vmatpush.bf16.msra.mxu2 %v1352_v42 }
  0xe2   :  { %1374 = vmatpush.bf16.msra.mxu2 %v1351_v43 }
 0x121   :  { %v426_v46 = vpop.f32.mrf.mxu0 }
 0x122   :  { %v445_v48 = vpop.f32.mrf.mxu1  ;;  %v427_v49 = vadd.f32 %v426_v46, %v216_v47 }
 0x124   :  { %v446_v56 = vadd.f32 %v445_v48, %v427_v49 }
 0x126   :  { %v456_v62 = vmax.f32 %v446_v56, 0.0 }
 0x127   :  { %v388_v50 = vpop.f32.mrf.mxu2 }
 0x128   :  { %v407_v52 = vpop.f32.mrf.mxu3  ;;  %v389_v60 = vadd.f32 %v388_v50, %v215_v51 }
 0x129   :  { %v428_v55 = vpop.f32.mrf.mxu0 }
 0x12a   :  { %v429_v57 = vadd.f32 %v428_v55, %v216_v47  ;;  %v447_v58 = vpop.f32.mrf.mxu1  ;;  %v408_v1 = vadd.f32 %v407_v52, %v389_v60  ;;  %v501_v52 = vperm.slane %v499_v45, 0 }
 0x12c   :  { %v448_v61 = vadd.f32 %v447_v58, %v429_v57  ;;  %v455_v8 = vmax.f32 %v408_v1, 0.0 }
 0x12e   :  { %v458_v63 = vmax.f32 %v448_v61, 0.0 }
 0x12f   :  { %v390_v0 = vpop.f32.mrf.mxu2 }
 0x130   :  { %v464_v2 = vpack.c.bf16 %v458_v63, %v456_v62  ;;  %v391_v3 = vadd.f32 %v390_v0, %v215_v51  ;;  %v409_v4 = vpop.f32.mrf.mxu3 }
 0x131   :  { %v431_v5 = vpop.f32.mrf.mxu0 }
 0x132   :  { %v410_v6 = vadd.f32 %v409_v4, %v391_v3  ;;  %v450_v7 = vpop.f32.mrf.mxu1  ;;  %692 = vmatmul.bf16.vlgmr.msrb.gmra.mxu3 %v464_v2  ;;  %730 = vmatmul.bf16.vlgmr.msra.gmra.mxu1 %v464_v2  ;;  %v432_v11 = vadd.f32 %v431_v5, %v216_v47 }
 0x134   :  { %v457_v9 = vmax.f32 %v410_v6, 0.0  ;;  %v451_v15 = vadd.f32 %v450_v7, %v432_v11 }
 0x136   :  { %v463_v10 = vpack.c.bf16 %v457_v9, %v455_v8  ;;  %v460_v20 = vmax.f32 %v451_v15, 0.0 }
 0x137   :  { %v393_v12 = vpop.f32.mrf.mxu2 }
 0x138   :  { %v412_v13 = vpop.f32.mrf.mxu3  ;;  %673 = vmatmul.bf16.vlgmr.msrb.gmra.mxu2 %v463_v10  ;;  %711 = vmatmul.bf16.vlgmr.msra.gmra.mxu0 %v463_v10  ;;  %v394_v18 = vadd.f32 %v393_v12, %v215_v51 }
 0x139   :  { %v433_v14 = vpop.f32.mrf.mxu0 }
 0x13a   :  { %v434_v16 = vadd.f32 %v433_v14, %v216_v47  ;;  %v452_v17 = vpop.f32.mrf.mxu1  ;;  %v413_v23 = vadd.f32 %v412_v13, %v394_v18  ;;  %v502_v47 = vperm.slane %v499_v45, 1 }
 0x13c   :  { %v453_v19 = vadd.f32 %v452_v17, %v434_v16  ;;  %v459_v28 = vmax.f32 %v413_v23, 0.0 }
 0x13e   :  { %v462_v21 = vmax.f32 %v453_v19, 0.0 }
 0x13f   :  { %v395_v22 = vpop.f32.mrf.mxu2 }
 0x140   :  { %v396_v24 = vadd.f32 %v395_v22, %v215_v51  ;;  %v466_v25 = vpack.c.bf16 %v462_v21, %v460_v20  ;;  %v414_v26 = vpop.f32.mrf.mxu3 }
 0x142   :  { %v415_v27 = vadd.f32 %v414_v26, %v396_v24  ;;  %697 = vmatmul.bf16.gmra.mxu3 %v466_v25  ;;  %735 = vmatmul.bf16.gmra.mxu1 %v466_v25 }
 0x144   :  { %v461_v29 = vmax.f32 %v415_v27, 0.0  ;;  %v1390_v27 = vld [vmem:[%s1605_s8] ss:$0 sm:$0xff] }
 0x146   :  { %v465_v30 = vpack.c.bf16 %v461_v29, %v459_v28 }
 0x148   :  { %678 = vmatmul.bf16.gmra.mxu2 %v465_v30  ;;  %716 = vmatmul.bf16.gmra.mxu0 %v465_v30 }
 0x1af   :  { %v731_v44 = vpop.f32.mrf.mxu1 }
 0x1b5   :  { %v712_v46 = vpop.f32.mrf.mxu0  ;;  %v693_v48 = vpop.f32.mrf.mxu3 }
 0x1b6   :  { %v713_v49 = vadd.f32 %v712_v46, %v502_v47 }
 0x1b7   :  { %v733_v50 = vpop.f32.mrf.mxu1 }
 0x1b8   :  { %v732_v54 = vadd.f32 %v731_v44, %v713_v49 }
 0x1ba   :  { %v742_v59 = vmax.f32 %v732_v54, 0.0 }
 0x1bb   :  { %v674_v51 = vpop.f32.mrf.mxu2 }
 0x1bc   :  { %v675_v56 = vadd.f32 %v674_v51, %v501_v52 }
 0x1bd   :  { %v714_v53 = vpop.f32.mrf.mxu0  ;;  %v695_v58 = vpop.f32.mrf.mxu3 }
 0x1be   :  { %v715_v55 = vadd.f32 %v714_v53, %v502_v47  ;;  %v694_v62 = vadd.f32 %v693_v48, %v675_v56 }
 0x1bf   :  { %v736_v1 = vpop.f32.mrf.mxu1 }
 0x1c0   :  { %v734_v57 = vadd.f32 %v733_v50, %v715_v55  ;;  %v741_v4 = vmax.f32 %v694_v62, 0.0 }
 0x1c2   :  { %v744_v60 = vmax.f32 %v734_v57, 0.0 }
 0x1c3   :  { %v676_v61 = vpop.f32.mrf.mxu2 }
 0x1c4   :  { %v750_v63 = vpack.c.bf16 %v744_v60, %v742_v59  ;;  %v677_v0 = vadd.f32 %v676_v61, %v501_v52 }
 0x1c5   :  { %v717_v2 = vpop.f32.mrf.mxu0  ;;  %v698_v8 = vpop.f32.mrf.mxu3 }
 0x1c6   :  { %v696_v3 = vadd.f32 %v695_v58, %v677_v0  ;;  %912 = vmatmul.bf16.vlgmr.msrb.gmra.mxu1 %v750_v63  ;;  %v718_v7 = vadd.f32 %v717_v2, %v502_v47 }
 0x1c7   :  { %v738_v13 = vpop.f32.mrf.mxu1 }
 0x1c8   :  { %v743_v5 = vmax.f32 %v696_v3, 0.0  ;;  %v737_v11 = vadd.f32 %v736_v1, %v718_v7 }
 0x1ca   :  { %v749_v6 = vpack.c.bf16 %v743_v5, %v741_v4  ;;  %v746_v16 = vmax.f32 %v737_v11, 0.0 }
 0x1cb   :  { %v679_v9 = vpop.f32.mrf.mxu2 }
 0x1cc   :  { %893 = vmatmul.bf16.vlgmr.msrb.gmra.mxu0 %v749_v6  ;;  %v680_v14 = vadd.f32 %v679_v9, %v501_v52 }
 0x1cd   :  { %v719_v10 = vpop.f32.mrf.mxu0  ;;  %v700_v22 = vpop.f32.mrf.mxu3 }
 0x1ce   :  { %v720_v12 = vadd.f32 %v719_v10, %v502_v47  ;;  %v699_v19 = vadd.f32 %v698_v8, %v680_v14 }
 0x1d0   :  { %v739_v15 = vadd.f32 %v738_v13, %v720_v12  ;;  %v745_v24 = vmax.f32 %v699_v19, 0.0 }
 0x1d2   :  { %v748_v17 = vmax.f32 %v739_v15, 0.0 }
 0x1d3   :  { %v681_v18 = vpop.f32.mrf.mxu2 }
 0x1d4   :  { %v752_v20 = vpack.c.bf16 %v748_v17, %v746_v16  ;;  %v682_v21 = vadd.f32 %v681_v18, %v501_v52 }
 0x1d6   :  { %v701_v23 = vadd.f32 %v700_v22, %v682_v21  ;;  %917 = vmatmul.bf16.vlgmr.msra.gmra.mxu3 %v752_v20 }
 0x1d8   :  { %v747_v25 = vmax.f32 %v701_v23, 0.0 }
 0x1da   :  { %v751_v26 = vpack.c.bf16 %v747_v25, %v745_v24 }
 0x1dc   :  { %898 = vmatmul.bf16.vlgmr.msra.gmra.mxu2 %v751_v26 }
 0x243   :  { %v913_v28 = vpop.f32.mrf.mxu1 }
 0x249   :  { %v894_v29 = vpop.f32.mrf.mxu0 }
 0x24a   :  { %v895_v30 = vadd.f32 %v1390_v27, %v894_v29 }
 0x24b   :  { %v915_v34 = vpop.f32.mrf.mxu1 }
 0x24c   :  { %v914_v31 = vadd.f32 %v913_v28, %v895_v30 }
 0x24e   :  { %923 = vst [vmem:[%s1606_s9] sm:$0xff] %v914_v31 }
 0x251   :  { %v896_v32 = vpop.f32.mrf.mxu0 }
 0x252   :  { %v897_v33 = vadd.f32 %v1390_v27, %v896_v32 }
 0x254   :  { %v916_v35 = vadd.f32 %v915_v34, %v897_v33 }
 0x256   :  { %924 = vst [vmem:[%s1606_s9 + $0x8] sm:$0xff] %v916_v35 }
 0x259   :  { %v918_v36 = vpop.f32.mrf.mxu3 }
 0x25f   :  { %v899_v37 = vpop.f32.mrf.mxu2 }
 0x260   :  { %v900_v38 = vadd.f32 %v1390_v27, %v899_v37 }
 0x261   :  { %v920_v42 = vpop.f32.mrf.mxu3 }
 0x262   :  { %v919_v39 = vadd.f32 %v918_v36, %v900_v38 }
 0x264   :  { %925 = vst [vmem:[%s1606_s9 + $0x10] sm:$0xff] %v919_v39 }
 0x267   :  { %v901_v40 = vpop.f32.mrf.mxu2 }
 0x268   :  { %v902_v41 = vadd.f32 %v1390_v27, %v901_v40 }
 0x26a   :  { %v921_v43 = vadd.f32 %v920_v42, %v902_v41 }
 0x26c   :  { %926 = vst [vmem:[%s1606_s9 + $0x18] sm:$0xff] %v921_v43 }
 0x26d   :  { %931 = vsyncpa [#allocation3], 1 }
 0x26e   :  { %932 = vsyncpa [#allocation5], 1 }

</bundles_post_ra>
